<compile_context>
chip_gen: v7x
topology: tpu7x:2x2x1
jax: 0.10.0
libtpu: 0.0.40
codegen_flags: <defaults>
</compile_context>

<pallas_src>
import jax
import jax.numpy as jnp
from jax.experimental import pallas as pl
from jax.experimental.pallas import tpu as pltpu


def simplenn_kernel(idx_ref, emb_ref, w_ref, b_ref, out_ref):
    B, S = idx_ref.shape
    V, D = emb_ref.shape

    # One vector load for the ids; slice the loaded value inside the unrolled loop.
    idx = idx_ref[...]

    # counts[b, v] = #{s : idx[b, s] == v}; exact integers (no pre-scaling).
    vocab_iota = jax.lax.broadcasted_iota(jnp.int32, (B, V), dimension=1)
    counts = jnp.zeros((B, V), jnp.float32)
    for s in range(S):
        counts = counts + (vocab_iota == idx[:, s:s + 1]).astype(jnp.float32)

    # Fold the D->1 head into the reduction:
    #   per-token score t[v] = emb[v, :] . w   (VPU mul + lane reduce, MXU stays free)
    t = jnp.sum(emb_ref[...] * w_ref[...], axis=-1, keepdims=True)        # (V, 1)

    #   out = (counts @ t) / S + bias          (single MXU matvec, B*V MACs)
    scores = jnp.dot(counts, t, preferred_element_type=jnp.float32)       # (B, 1)
    out_ref[...] = scores * jnp.float32(1.0 / S) + b_ref[0, 0]


def simplenn_forward(indices, emb_table, w_row, bias):
    B, _ = indices.shape
    return pl.pallas_call(
        simplenn_kernel,
        out_shape=jax.ShapeDtypeStruct((B, 1), jnp.float32),
        in_specs=[
            pl.BlockSpec(memory_space=pltpu.MemorySpace.VMEM),   # indices (B, S) int32
            pl.BlockSpec(memory_space=pltpu.MemorySpace.VMEM),   # embedding table (V, D)
            pl.BlockSpec(memory_space=pltpu.MemorySpace.VMEM),   # fc weight row (1, D)
            pl.BlockSpec(memory_space=pltpu.MemorySpace.SMEM),   # fc bias (1, 1) scalar
        ],
        out_specs=pl.BlockSpec(memory_space=pltpu.MemorySpace.VMEM),
    )(indices, emb_table, w_row, bias)


if __name__ == "__main__":
    vocab_size, embedding_dim = 100, 50

    key = jax.random.PRNGKey(0)
    k_emb, k_w, k_b = jax.random.split(key, 3)

    # nn.Embedding default init: N(0, 1)
    emb_table = jax.random.normal(k_emb, (vocab_size, embedding_dim), jnp.float32)
    # nn.Linear default init: U(-1/sqrt(fan_in), 1/sqrt(fan_in))
    bound = 1.0 / jnp.sqrt(jnp.float32(embedding_dim))
    w = jax.random.uniform(k_w, (1, embedding_dim), jnp.float32, -bound, bound)
    b = jax.random.uniform(k_b, (1,), jnp.float32, -bound, bound)

    # glue: weight stays a lane-dense (1, D) row; bias reshaped to (1, 1) for SMEM
    b2 = b.reshape(1, 1)

    indices = jnp.array([[1, 2, 3], [4, 5, 6]], dtype=jnp.int32)   # (B=2, S=3)

    out = simplenn_forward(indices, emb_table, w, b2)
    out = jax.block_until_ready(out)

    # pure-JAX reference check (gather -> mean over seq -> Linear)
    ref = jnp.mean(emb_table[indices], axis=1) @ w.T + b2
    assert out.shape == (2, 1)
    assert jnp.allclose(out, ref, atol=1e-5, rtol=1e-5)

    print("KERNEL_OK")
</pallas_src>

<mosaic_0001>
module attributes {stable_mosaic.version = 11 : i64} {
  func.func @simplenn_kernel(%arg0: memref<2x3xi32, #tpu.memory_space<vmem>>, %arg1: memref<100x50xf32, #tpu.memory_space<vmem>>, %arg2: memref<1x50xf32, #tpu.memory_space<vmem>>, %arg3: memref<1x1xf32, #tpu.memory_space<smem>>, %arg4: memref<2x1xf32, #tpu.memory_space<vmem>>) attributes {dimension_semantics = [], scalar_prefetch = 0 : i64, scratch_operands = 0 : i64, tpu.core_type = #tpu.core_type<tc>} {
    %c0 = arith.constant 0 : index
    %c0_0 = arith.constant 0 : index
    %0 = vector.load %arg0[%c0, %c0_0] : memref<2x3xi32, #tpu.memory_space<vmem>>, vector<2x3xi32>
    %1 = tpu.iota {dimensions = array<i32: 1>} : vector<2x100xi32>
    %cst = arith.constant 0.000000e+00 : f32
    %2 = vector.broadcast %cst : f32 to vector<2x100xf32>
    %3 = vector.extract_strided_slice %0 {offsets = [0, 0], sizes = [2, 1], strides = [1, 1]} : vector<2x3xi32> to vector<2x1xi32>
    %4 = vector.broadcast %3 : vector<2x1xi32> to vector<2x100xi32>
    %5 = arith.cmpi eq, %1, %4 : vector<2x100xi32>
    %6 = arith.extui %5 : vector<2x100xi1> to vector<2x100xi32>
    %7 = arith.sitofp %6 : vector<2x100xi32> to vector<2x100xf32>
    %8 = arith.addf %2, %7 : vector<2x100xf32>
    %9 = vector.extract_strided_slice %0 {offsets = [0, 1], sizes = [2, 1], strides = [1, 1]} : vector<2x3xi32> to vector<2x1xi32>
    %10 = vector.broadcast %9 : vector<2x1xi32> to vector<2x100xi32>
    %11 = arith.cmpi eq, %1, %10 : vector<2x100xi32>
    %12 = arith.extui %11 : vector<2x100xi1> to vector<2x100xi32>
    %13 = arith.sitofp %12 : vector<2x100xi32> to vector<2x100xf32>
    %14 = arith.addf %8, %13 : vector<2x100xf32>
    %15 = vector.extract_strided_slice %0 {offsets = [0, 2], sizes = [2, 1], strides = [1, 1]} : vector<2x3xi32> to vector<2x1xi32>
    %16 = vector.broadcast %15 : vector<2x1xi32> to vector<2x100xi32>
    %17 = arith.cmpi eq, %1, %16 : vector<2x100xi32>
    %18 = arith.extui %17 : vector<2x100xi1> to vector<2x100xi32>
    %19 = arith.sitofp %18 : vector<2x100xi32> to vector<2x100xf32>
    %20 = arith.addf %14, %19 : vector<2x100xf32>
    %c0_1 = arith.constant 0 : index
    %c0_2 = arith.constant 0 : index
    %21 = vector.load %arg1[%c0_1, %c0_2] : memref<100x50xf32, #tpu.memory_space<vmem>>, vector<100x50xf32>
    %c0_3 = arith.constant 0 : index
    %c0_4 = arith.constant 0 : index
    %22 = vector.load %arg2[%c0_3, %c0_4] : memref<1x50xf32, #tpu.memory_space<vmem>>, vector<1x50xf32>
    %23 = vector.broadcast %22 : vector<1x50xf32> to vector<100x50xf32>
    %24 = arith.mulf %21, %23 : vector<100x50xf32>
    %cst_5 = arith.constant dense<0.000000e+00> : vector<100xf32>
    %25 = vector.multi_reduction <add>, %24, %cst_5 [1] : vector<100x50xf32> to vector<100xf32>
    %26 = vector.shape_cast %25 : vector<100xf32> to vector<100x1xf32>
    %cst_6 = arith.constant dense<0.000000e+00> : vector<2x1xf32>
    %27 = tpu.matmul %20, %26, %cst_6 {dimension_numbers = #tpu.dot_dimension_numbers<[1], [0], [0], [1], [0, 0, 1, 1], [], []>} : vector<2x100xf32>, vector<100x1xf32>, vector<2x1xf32> -> vector<2x1xf32>
    %cst_7 = arith.constant 0.333333343 : f32
    %28 = vector.broadcast %cst_7 : f32 to vector<2x1xf32>
    %29 = arith.mulf %27, %28 : vector<2x1xf32>
    %c0_8 = arith.constant 0 : index
    %c0_9 = arith.constant 0 : index
    %30 = memref.load %arg3[%c0_8, %c0_9] : memref<1x1xf32, #tpu.memory_space<smem>>
    %31 = vector.broadcast %30 : f32 to vector<2x1xf32>
    %32 = arith.addf %29, %31 : vector<2x1xf32>
    %c0_10 = arith.constant 0 : index
    %c0_11 = arith.constant 0 : index
    %33 = vector.load %arg4[%c0_10, %c0_11] : memref<2x1xf32, #tpu.memory_space<vmem>>, vector<2x1xf32>
    tpu.vector_store %arg4[%c0_10, %c0_11], %32 {strides = array<i32>} : memref<2x1xf32, #tpu.memory_space<vmem>>, vector<2x1xf32>,
    return
  }
}

</mosaic_0001>

<bundles_post_ra>
// kernel: tpu_custom_call.1
= control target key start
LH: loop header
LB: loop body
LE: loop exit
PB: predicated region body
PF: predicated region fallthrough
CT: control target
= control target key end

     0   :  { %vm75_vm0 = vcmask 408576   ;;  %v281_v3 = vmov 0   ;;  %v282_v4 = vmov 1   ;;  %vm112_vm1 = vcmask 404480   ;;  %s375_s1 = inlined_call_operand.vmem [shape: f32[100,50], index: 1, kind: input, shape index: {}]   ;;  %s376_s2 = inlined_call_operand.vmem [shape: f32[1,50], index: 2, kind: input, shape index: {}]   ;;  %s377_s0 = inlined_call_operand.vmem [shape: s32[2,3], index: 0, kind: input, shape index: {}]   ;;  %s378_s3 = inlined_call_operand.<no memory space> [shape: f32[1,1], index: 3, kind: input, shape index: {}]   ;;  %s379_s4 = inlined_call_operand.vmem [shape: f32[2,1], index: 4, kind: output, shape index: {}]  }
   0x1   :  { %v44_v0 = vld [vmem:[%s375_s1 + $0x10] sm:$0xff]  ;;  %v207_v1 = vld [vmem:[%s376_s2] ss:$0 sm:$0xff]  ;;  %277 = vset.pattern.permute.xlu1 %v281_v3  ;;  %278 = vset.pattern.permute.xlu0 %v282_v4  ;;  %v45_v7 = vld [vmem:[%s375_s1 + $0x18] sm:$0xff]  ;;  %v283_v41 = vmov 0.0|0.0   ;;  %v284_v44 = vmov 2   ;;  %v19_v63 = vlaneseq }
   0x2   :  { %v42_v2 = vld [vmem:[%s375_s1] sm:$0xff]  ;;  %v64_v5 = vmul.f32 %v207_v1, %v44_v0  ;;  %v43_v8 = vld [vmem:[%s375_s1 + $0x8] sm:$0xff]  ;;  %v65_v9 = vmul.f32 %v207_v1, %v45_v7  ;;  %v49_v19 = vld [vmem:[%s375_s1 + $0x38] sm:$0xff]  ;;  %253 = vmatprep.subr.bf16.mxu0 %v283_v41  ;;  %vm285_vm2 = vmmov 0   ;;  %v286_v45 = vmov 0.0  }
   0x3   :  { %v62_v6 = vmul.f32 %v207_v1, %v42_v2  ;;  %v63_v10 = vmul.f32 %v207_v1, %v43_v8  ;;  %v47_v11 = vld [vmem:[%s375_s1 + $0x28] sm:$0xff]  ;;  %v46_v12 = vld [vmem:[%s375_s1 + $0x20] sm:$0xff]  ;;  %v48_v20 = vld [vmem:[%s375_s1 + $0x30] sm:$0xff]  ;;  %v69_v23 = vmul.f32 %v207_v1, %v49_v19  ;;  %250 = vmatprep.mubr.msk.f32.mxu0 %vm285_vm2, %v286_v45  ;;  %v20_v2 = vand.u32 127, %v19_v63 }
   0x4   :  { %v82_v13 = vsel %vm75_vm0, %v64_v5, 0.0  ;;  %v85_v15 = vsel %vm75_vm0, %v65_v9, 0.0  ;;  %v67_v17 = vmul.f32 %v207_v1, %v47_v11  ;;  %v66_v18 = vmul.f32 %v207_v1, %v46_v12  ;;  %v51_v25 = vld [vmem:[%s375_s1 + $0x48] sm:$0xff]  ;;  %v50_v26 = vld [vmem:[%s375_s1 + $0x40] sm:$0xff]  ;;  %v53_v31 = vld [vmem:[%s375_s1 + $0x58] sm:$0xff] }
   0x5   :  { %v76_v14 = vsel %vm75_vm0, %v62_v6, 0.0  ;;  %83 = vadd.xlane.f32.xlu1 %v82_v13  ;;  %v79_v16 = vsel %vm75_vm0, %v63_v10, 0.0  ;;  %v68_v24 = vmul.f32 %v207_v1, %v48_v20  ;;  %v97_v27 = vsel %vm75_vm0, %v69_v23, 0.0  ;;  %v52_v32 = vld [vmem:[%s375_s1 + $0x50] sm:$0xff]  ;;  %v54_v37 = vld [vmem:[%s375_s1 + $0x60] sm:$0xf] }
   0x6   :  { %77 = vadd.xlane.f32.xlu0 %v76_v14  ;;  %v91_v21 = vsel %vm75_vm0, %v67_v17, 0.0  ;;  %v88_v22 = vsel %vm75_vm0, %v66_v18, 0.0  ;;  %v71_v29 = vmul.f32 %v207_v1, %v51_v25  ;;  %v70_v30 = vmul.f32 %v207_v1, %v50_v26  ;;  %v18_v43 = vld [vmem:[%s377_s0] sm:$0x3] }
   0x7   :  { %v94_v28 = vsel %vm75_vm0, %v68_v24, 0.0  ;;  %v73_v35 = vmul.f32 %v207_v1, %v53_v31  ;;  %v72_v36 = vmul.f32 %v207_v1, %v52_v32  ;;  %v74_v40 = vmul.f32 %v207_v1, %v54_v37 }
   0x8   :  { %v103_v33 = vsel %vm75_vm0, %v71_v29, 0.0  ;;  %v100_v34 = vsel %vm75_vm0, %v70_v30, 0.0  ;;  %vm120_vm3 = vcmask 1043456   ;;  %vm116_vm7 = vcmask 818176  }
   0x9   :  { %86 = vadd.xlane.f32.xlu1 %v85_v15  ;;  %v109_v38 = vsel %vm75_vm0, %v73_v35, 0.0  ;;  %v106_v39 = vsel %vm75_vm0, %v72_v36, 0.0  ;;  %v113_v42 = vsel %vm112_vm1, %v74_v40, 0.0  ;;  %v196_v12 = vstv %s378_s3 }
   0xa   :  { %80 = vadd.xlane.f32.xlu0 %v79_v16  ;;  %vm198_vm8 = vcmask 1024  }
   0xd   :  { %92 = vadd.xlane.f32.xlu1 %v91_v21 }
   0xe   :  { %89 = vadd.xlane.f32.xlu0 %v88_v22 }
  0x11   :  { %98 = vadd.xlane.f32.xlu1 %v97_v27 }
  0x12   :  { %95 = vadd.xlane.f32.xlu0 %v94_v28 }
  0x15   :  { %104 = vadd.xlane.f32.xlu1 %v103_v33 }
  0x16   :  { %101 = vadd.xlane.f32.xlu0 %v100_v34 }
  0x19   :  { %110 = vadd.xlane.f32.xlu1 %v109_v38 }
  0x1a   :  { %107 = vadd.xlane.f32.xlu0 %v106_v39 }
  0x1e   :  { %114 = vadd.xlane.f32.xlu0 %v113_v42 }
  0x2a   :  { %22 = vperm.xlu1 %277, %v18_v43  }
  0x2e   :  { %279 = vset.pattern.permute.xlu1 %v284_v44 }
  0x2f   :  { %36 = vperm.xlu1 %279, %v18_v43  }
  0x34   :  { %29 = vperm.xlu0 %278, %v18_v43  }
  0x38   :  { %280 = vset.pattern.permute.xlu0 %v284_v44 }
  0x92   :  { %v84_v46 = vpop.xlane.xlu1 %83 }
  0x93   :  { %v78_v47 = vpop.xlane.xlu0 %77 }
  0x96   :  { %v87_v48 = vpop.xlane.xlu1 %86 }
  0x97   :  { %v81_v49 = vpop.xlane.xlu0 %80  ;;  %v257_v53 = vpack.c.bf16 %v87_v48, %v84_v46 }
  0x98   :  { %v254_v50 = vpack.c.bf16 %v81_v49, %v78_v47 }
  0x9a   :  { %255 = vmatpush3.bf16.msra.mxu0 %v254_v50  ;;  %v93_v51 = vpop.xlane.xlu1 %92 }
  0x9b   :  { %v90_v52 = vpop.xlane.xlu0 %89  ;;  %256 = vmatprep.subr.bf16.mxu0 %v283_v41 }
  0x9c   :  { %v260_v56 = vpack.c.bf16 %v93_v51, %v90_v52 }
  0x9e   :  { %258 = vmatpush3.bf16.msra.mxu0 %v257_v53  ;;  %v99_v54 = vpop.xlane.xlu1 %98 }
  0x9f   :  { %v96_v55 = vpop.xlane.xlu0 %95  ;;  %259 = vmatprep.subr.bf16.mxu0 %v283_v41 }
  0xa0   :  { %v263_v59 = vpack.c.bf16 %v99_v54, %v96_v55 }
  0xa2   :  { %261 = vmatpush3.bf16.msra.mxu0 %v260_v56  ;;  %v105_v57 = vpop.xlane.xlu1 %104 }
  0xa3   :  { %v102_v58 = vpop.xlane.xlu0 %101  ;;  %262 = vmatprep.subr.bf16.mxu0 %v283_v41 }
  0xa4   :  { %v266_v61 = vpack.c.bf16 %v105_v57, %v102_v58 }
  0xa6   :  { %264 = vmatpush3.bf16.msra.mxu0 %v263_v59  ;;  %v111_v60 = vpop.xlane.xlu1 %110 }
  0xa7   :  { %265 = vmatprep.subr.bf16.mxu0 %v283_v41  ;;  %v108_v62 = vpop.xlane.xlu0 %107 }
  0xa8   :  { %v269_v1 = vpack.c.bf16 %v111_v60, %v108_v62 }
  0xaa   :  { %267 = vmatpush3.bf16.msra.mxu0 %v266_v61  ;;  %v23_v0 = vpop.permute.xlu1 %22 }
  0xab   :  { %268 = vmatprep.subr.bf16.mxu0 %v283_v41  ;;  %v115_v3 = vpop.xlane.xlu0 %114  ;;  %vm24_vm4 = vcmp.eq.s32.totalorder %v20_v2, %v23_v0 }
  0xac   :  { %v204_v6 = vsel %vm24_vm4, 1.0, %v286_v45 }
  0xae   :  { %270 = vmatpush3.bf16.msra.mxu0 %v269_v1  ;;  %v37_v4 = vpop.permute.xlu1 %36 }
  0xaf   :  { %248 = vmatprep.subr.mxu0 %v286_v45  ;;  %vm38_vm5 = vcmp.eq.s32.totalorder %v20_v2, %v37_v4 }
  0xb0   :  { %v206_v8 = vsel %vm38_vm5, 1.0, %v286_v45 }
  0xb2   :  { %249 = vmatpush3.msk.msra.mxu0 %vm120_vm3, %v115_v3 }
  0xb3   :  { %v30_v5 = vpop.permute.xlu0 %29 }
  0xb4   :  { %vm31_vm6 = vcmp.eq.s32.totalorder %v20_v2, %v30_v5 }
  0xb5   :  { %v205_v7 = vsel %vm31_vm6, 1.0, %v286_v45 }
  0xb6   :  { %v34_v9 = vadd.f32 %v205_v7, %v204_v6 }
  0xb8   :  { %v41_v10 = vadd.f32 %v206_v8, %v34_v9 }
  0xba   :  { %251 = vmatmul.mubr.msk.f32.vlgmr.msra.gmra.mrb[0].mxu0 %vm116_vm7, %v41_v10 }
 0x18d   :  { %v190_v11 = vpop.f32.mrb[0].mxu0 }
 0x18e   :  { %v194_v13 = vmul.f32 0.33333334, %v190_v11  ;;  %v252_v14 = vpop.f32.mrb[1].mxu0 }
 0x190   :  { %v197_v15 = vadd.f32 %v196_v12, %v194_v13 }
 0x192   :  { %199 = vst.msk [vmem:[%s379_s4] sm:$0x3] %vm198_vm8, %v197_v15 }

</bundles_post_ra>
